<compile_context>
chip_gen: v5e
topology: v5e:2x2
jax: 0.10.0
libtpu: 0.0.40
codegen_flags: <defaults>
</compile_context>

<pallas_src>
import functools

import jax
import jax.numpy as jnp
from jax.experimental import pallas as pl
from jax.experimental.pallas import tpu as pltpu

LANE = 128


def _round_up(x, m):
    return ((x + m - 1) // m) * m


def _policy_kernel(s_ref, w1_ref, b1_ref, w2_ref, b2_ref, w3_ref, b3_ref, out_ref,
                   *, action_dim):
    # Layer 1: Linear (bf16 MXU, f32 accumulate) + ReLU (f32 VPU)
    x = s_ref[...].astype(jnp.bfloat16)
    h = jnp.dot(x, w1_ref[...], preferred_element_type=jnp.float32) + b1_ref[...]
    h = jnp.maximum(h, 0.0)
    # Layer 2: Linear + ReLU
    h = jnp.dot(h.astype(jnp.bfloat16), w2_ref[...],
                preferred_element_type=jnp.float32) + b2_ref[...]
    h = jnp.maximum(h, 0.0)
    # Output layer: Linear (padded to lane width) + Identity
    logits = jnp.dot(h.astype(jnp.bfloat16), w3_ref[...],
                     preferred_element_type=jnp.float32) + b3_ref[...]
    # Mask out the padded action columns so they contribute ~0 to the softmax.
    lane = jax.lax.broadcasted_iota(jnp.int32, logits.shape, 1)
    logits = jnp.where(lane < action_dim, logits, -1e30)
    # Numerically stable softmax over dim=1 (action dimension).
    m = jnp.max(logits, axis=1, keepdims=True)
    e = jnp.exp(logits - m)
    denom = jnp.sum(e, axis=1, keepdims=True)
    out_ref[...] = (e * pl.reciprocal(denom, approx=True)).astype(out_ref.dtype)


def policy_net_forward(s, params, *, tile_b=1024):
    """Fused MLP + softmax forward pass. s: (B, state_dim) float32. Returns (B, action_dim)."""
    w1, b1, w2, b2, w3, b3 = params
    B, state_dim = s.shape
    h1 = w1.shape[1]
    h2 = w2.shape[1]
    action_dim = w3.shape[1]

    # Lane-dense output: pad the action dimension up to a multiple of 128.
    a_pad = _round_up(action_dim, LANE)
    w3_p = jnp.pad(w3, ((0, 0), (0, a_pad - action_dim)))
    b3_p = jnp.pad(b3, ((0, 0), (0, a_pad - action_dim)))

    # Batch tiling: big tiles for throughput, but never bigger than the (8-aligned) batch.
    tile = min(tile_b, _round_up(B, 8))
    tile = _round_up(tile, 8)
    b_pad = _round_up(B, tile)
    s_p = jnp.pad(s, ((0, b_pad - B), (0, 0))) if b_pad != B else s
    n_tiles = b_pad // tile

    # Explicit VMEM budget: double-buffered s/out tiles + resident weights + activation headroom.
    weight_bytes = sum(int(a.size) * a.dtype.itemsize for a in (w1, b1, w2, b2, w3_p, b3_p))
    vmem_bytes = (2 * tile * state_dim * 4          # input tile, double buffered
                  + 2 * tile * a_pad * 4            # output tile, double buffered
                  + 2 * weight_bytes                # resident weights (+ slack)
                  + 4 * tile * max(h1, h2, a_pad) * 4  # f32 intermediates headroom
                  + (4 << 20))                      # compiler temporaries
    vmem_limit = int(min(vmem_bytes, 48 * 1024 * 1024))  # fits v7x's 64 MiB VMEM

    kernel = functools.partial(_policy_kernel, action_dim=action_dim)

    out = pl.pallas_call(
        kernel,
        out_shape=jax.ShapeDtypeStruct((b_pad, a_pad), jnp.float32),
        grid_spec=pltpu.PrefetchScalarGridSpec(
            num_scalar_prefetch=0,
            grid=(n_tiles,),
            in_specs=[
                pl.BlockSpec((tile, state_dim), lambda i: (i, 0)),   # s: batch-tiled
                pl.BlockSpec(w1.shape, lambda i: (0, 0)),            # weights/biases: resident
                pl.BlockSpec(b1.shape, lambda i: (0, 0)),
                pl.BlockSpec(w2.shape, lambda i: (0, 0)),
                pl.BlockSpec(b2.shape, lambda i: (0, 0)),
                pl.BlockSpec(w3_p.shape, lambda i: (0, 0)),
                pl.BlockSpec(b3_p.shape, lambda i: (0, 0)),
            ],
            out_specs=pl.BlockSpec((tile, a_pad), lambda i: (i, 0)),
        ),
        compiler_params=pltpu.CompilerParams(
            dimension_semantics=("parallel",),        # shard batch tiles across TCs (v7x)
            vmem_limit_bytes=vmem_limit,
        ),
    )(s_p, w1, b1, w2, b2, w3_p, b3_p)

    return out[:B, :action_dim]


def init_policy_params(key, state_dim, hid_shape, action_dim):
    """Init matching Policy_Net layer shapes. Weights stored (in, out) in bf16; biases (1, out) f32.
    Uses uniform(-1/sqrt(fan_in), 1/sqrt(fan_in)) like torch.nn.Linear defaults."""
    dims = [state_dim] + list(hid_shape) + [action_dim]
    params = []
    for j in range(len(dims) - 1):
        fan_in, fan_out = dims[j], dims[j + 1]
        key, kw, kb = jax.random.split(key, 3)
        bound = 1.0 / jnp.sqrt(jnp.float32(fan_in))
        w = jax.random.uniform(kw, (fan_in, fan_out), jnp.float32, -bound, bound)
        b = jax.random.uniform(kb, (1, fan_out), jnp.float32, -bound, bound)
        params += [w.astype(jnp.bfloat16), b]
    return tuple(params)


def _reference_forward(s, params):
    """Pure-JAX reference mirroring the kernel's numerics (bf16 matmuls, f32 accumulate)."""
    w1, b1, w2, b2, w3, b3 = params
    bf = jnp.bfloat16
    h = jnp.maximum(jnp.dot(s.astype(bf), w1, preferred_element_type=jnp.float32) + b1, 0.0)
    h = jnp.maximum(jnp.dot(h.astype(bf), w2, preferred_element_type=jnp.float32) + b2, 0.0)
    logits = jnp.dot(h.astype(bf), w3, preferred_element_type=jnp.float32) + b3
    return jax.nn.softmax(logits, axis=1)


if __name__ == "__main__":
    state_dim = 32
    hid_shape = (64, 64)
    action_dim = 16
    batch = 8

    key = jax.random.PRNGKey(0)
    k_s, k_p, k_s2 = jax.random.split(key, 3)
    params = init_policy_params(k_p, state_dim, hid_shape, action_dim)

    # Small-batch path (single grid step).
    s = jax.random.normal(k_s, (batch, state_dim), jnp.float32)
    probs = jax.block_until_ready(policy_net_forward(s, params))
    ref = _reference_forward(s, params)
    assert probs.shape == (batch, action_dim)
    assert jnp.allclose(probs, ref, atol=5e-3)
    assert jnp.allclose(jnp.sum(probs, axis=1), 1.0, atol=5e-3)

    # Tiled path: batch not a multiple of the tile -> exercises padding + multi-step grid.
    batch2 = 1030
    s2 = jax.random.normal(k_s2, (batch2, state_dim), jnp.float32)
    probs2 = jax.block_until_ready(policy_net_forward(s2, params, tile_b=512))
    ref2 = _reference_forward(s2, params)
    assert probs2.shape == (batch2, action_dim)
    assert jnp.allclose(probs2, ref2, atol=5e-3)
    assert jnp.allclose(jnp.sum(probs2, axis=1), 1.0, atol=5e-3)

    print("KERNEL_OK")
</pallas_src>

<mosaic_0001>
module attributes {stable_mosaic.version = 11 : i64} {
  func.func @_policy_kernel(%arg0: i32, %arg1: memref<8x32xf32, #tpu.memory_space<vmem>>, %arg2: memref<32x64xbf16, #tpu.memory_space<vmem>>, %arg3: memref<1x64xf32, #tpu.memory_space<vmem>>, %arg4: memref<64x64xbf16, #tpu.memory_space<vmem>>, %arg5: memref<1x64xf32, #tpu.memory_space<vmem>>, %arg6: memref<64x128xbf16, #tpu.memory_space<vmem>>, %arg7: memref<1x128xf32, #tpu.memory_space<vmem>>, %arg8: memref<8x128xf32, #tpu.memory_space<vmem>>) attributes {dimension_semantics = [#tpu.dimension_semantics<parallel>], iteration_bounds = array<i64: 1>, scalar_prefetch = 0 : i64, scratch_operands = 0 : i64, tpu.core_type = #tpu.core_type<tc>, window_params = [{transform_indices = @transform_0, window_bounds = array<i64: 8, 32>}, {pipeline_mode = #tpu.pipeline_mode<synchronous>, transform_indices = @transform_1, window_bounds = array<i64: 32, 64>}, {pipeline_mode = #tpu.pipeline_mode<synchronous>, transform_indices = @transform_2, window_bounds = array<i64: 1, 64>}, {pipeline_mode = #tpu.pipeline_mode<synchronous>, transform_indices = @transform_3, window_bounds = array<i64: 64, 64>}, {pipeline_mode = #tpu.pipeline_mode<synchronous>, transform_indices = @transform_4, window_bounds = array<i64: 1, 64>}, {pipeline_mode = #tpu.pipeline_mode<synchronous>, transform_indices = @transform_5, window_bounds = array<i64: 64, 128>}, {pipeline_mode = #tpu.pipeline_mode<synchronous>, transform_indices = @transform_6, window_bounds = array<i64: 1, 128>}, {transform_indices = @transform_7, window_bounds = array<i64: 8, 128>}]} {
    %c0 = arith.constant 0 : index
    %c0_0 = arith.constant 0 : index
    %0 = vector.load %arg1[%c0, %c0_0] : memref<8x32xf32, #tpu.memory_space<vmem>>, vector<8x32xf32>
    %1 = arith.truncf %0 : vector<8x32xf32> to vector<8x32xbf16>
    %c0_1 = arith.constant 0 : index
    %c0_2 = arith.constant 0 : index
    %2 = vector.load %arg2[%c0_1, %c0_2] : memref<32x64xbf16, #tpu.memory_space<vmem>>, vector<32x64xbf16>
    %cst = arith.constant dense<0.000000e+00> : vector<8x64xf32>
    %3 = tpu.matmul %1, %2, %cst {dimension_numbers = #tpu.dot_dimension_numbers<[1], [0], [0], [1], [0, 0, 1, 1], [], []>} : vector<8x32xbf16>, vector<32x64xbf16>, vector<8x64xf32> -> vector<8x64xf32>
    %c0_3 = arith.constant 0 : index
    %c0_4 = arith.constant 0 : index
    %4 = vector.load %arg3[%c0_3, %c0_4] : memref<1x64xf32, #tpu.memory_space<vmem>>, vector<1x64xf32>
    %5 = vector.broadcast %4 : vector<1x64xf32> to vector<8x64xf32>
    %6 = arith.addf %3, %5 : vector<8x64xf32>
    %cst_5 = arith.constant 0.000000e+00 : f32
    %7 = vector.broadcast %cst_5 : f32 to vector<8x64xf32>
    %8 = arith.maximumf %6, %7 : vector<8x64xf32>
    %9 = arith.truncf %8 : vector<8x64xf32> to vector<8x64xbf16>
    %c0_6 = arith.constant 0 : index
    %c0_7 = arith.constant 0 : index
    %10 = vector.load %arg4[%c0_6, %c0_7] : memref<64x64xbf16, #tpu.memory_space<vmem>>, vector<64x64xbf16>
    %cst_8 = arith.constant dense<0.000000e+00> : vector<8x64xf32>
    %11 = tpu.matmul %9, %10, %cst_8 {dimension_numbers = #tpu.dot_dimension_numbers<[1], [0], [0], [1], [0, 0, 1, 1], [], []>} : vector<8x64xbf16>, vector<64x64xbf16>, vector<8x64xf32> -> vector<8x64xf32>
    %c0_9 = arith.constant 0 : index
    %c0_10 = arith.constant 0 : index
    %12 = vector.load %arg5[%c0_9, %c0_10] : memref<1x64xf32, #tpu.memory_space<vmem>>, vector<1x64xf32>
    %13 = vector.broadcast %12 : vector<1x64xf32> to vector<8x64xf32>
    %14 = arith.addf %11, %13 : vector<8x64xf32>
    %cst_11 = arith.constant 0.000000e+00 : f32
    %15 = vector.broadcast %cst_11 : f32 to vector<8x64xf32>
    %16 = arith.maximumf %14, %15 : vector<8x64xf32>
    %17 = arith.truncf %16 : vector<8x64xf32> to vector<8x64xbf16>
    %c0_12 = arith.constant 0 : index
    %c0_13 = arith.constant 0 : index
    %18 = vector.load %arg6[%c0_12, %c0_13] : memref<64x128xbf16, #tpu.memory_space<vmem>>, vector<64x128xbf16>
    %cst_14 = arith.constant dense<0.000000e+00> : vector<8x128xf32>
    %19 = tpu.matmul %17, %18, %cst_14 {dimension_numbers = #tpu.dot_dimension_numbers<[1], [0], [0], [1], [0, 0, 1, 1], [], []>} : vector<8x64xbf16>, vector<64x128xbf16>, vector<8x128xf32> -> vector<8x128xf32>
    %c0_15 = arith.constant 0 : index
    %c0_16 = arith.constant 0 : index
    %20 = vector.load %arg7[%c0_15, %c0_16] : memref<1x128xf32, #tpu.memory_space<vmem>>, vector<1x128xf32>
    %21 = vector.broadcast %20 : vector<1x128xf32> to vector<8x128xf32>
    %22 = arith.addf %19, %21 : vector<8x128xf32>
    %23 = tpu.iota {dimensions = array<i32: 1>} : vector<8x128xi32>
    %c16_i32 = arith.constant 16 : i32
    %24 = vector.broadcast %c16_i32 : i32 to vector<8x128xi32>
    %25 = arith.cmpi slt, %23, %24 : vector<8x128xi32>
    %cst_17 = arith.constant -1.000000e+30 : f32
    %26 = vector.broadcast %cst_17 : f32 to vector<8x128xf32>
    %27 = arith.select %25, %22, %26 : vector<8x128xi1>, vector<8x128xf32>
    %cst_18 = arith.constant dense<0xFF800000> : vector<8xf32>
    %28 = vector.multi_reduction <maximumf>, %27, %cst_18 [1] : vector<8x128xf32> to vector<8xf32>
    %29 = vector.shape_cast %28 : vector<8xf32> to vector<8x1xf32>
    %30 = vector.broadcast %29 : vector<8x1xf32> to vector<8x128xf32>
    %31 = arith.subf %27, %30 : vector<8x128xf32>
    %32 = math.exp %31 : vector<8x128xf32>
    %cst_19 = arith.constant dense<0.000000e+00> : vector<8xf32>
    %33 = vector.multi_reduction <add>, %32, %cst_19 [1] : vector<8x128xf32> to vector<8xf32>
    %34 = vector.shape_cast %33 : vector<8xf32> to vector<8x1xf32>
    %35 = tpu.reciprocal %34 {approx = true} : vector<8x1xf32> -> vector<8x1xf32>
    %36 = vector.broadcast %35 : vector<8x1xf32> to vector<8x128xf32>
    %37 = arith.mulf %32, %36 : vector<8x128xf32>
    %c0_20 = arith.constant 0 : index
    %c0_21 = arith.constant 0 : index
    %38 = vector.load %arg8[%c0_20, %c0_21] : memref<8x128xf32, #tpu.memory_space<vmem>>, vector<8x128xf32>
    tpu.vector_store %arg8[%c0_20, %c0_21], %37 {strides = array<i32>} : memref<8x128xf32, #tpu.memory_space<vmem>>, vector<8x128xf32>,
    return
  }
  func.func @transform_0(%arg0: i32) -> (i32, i32) {
    %c0_i32 = arith.constant 0 : i32
    %c0_i32_0 = arith.constant 0 : i32
    return %arg0, %c0_i32 : i32, i32
  }
  func.func @transform_1(%arg0: i32) -> (i32, i32) {
    %c0_i32 = arith.constant 0 : i32
    %c0_i32_0 = arith.constant 0 : i32
    %c0_i32_1 = arith.constant 0 : i32
    return %c0_i32, %c0_i32_0 : i32, i32
  }
  func.func @transform_2(%arg0: i32) -> (i32, i32) {
    %c0_i32 = arith.constant 0 : i32
    %c0_i32_0 = arith.constant 0 : i32
    %c0_i32_1 = arith.constant 0 : i32
    return %c0_i32, %c0_i32_0 : i32, i32
  }
  func.func @transform_3(%arg0: i32) -> (i32, i32) {
    %c0_i32 = arith.constant 0 : i32
    %c0_i32_0 = arith.constant 0 : i32
    %c0_i32_1 = arith.constant 0 : i32
    return %c0_i32, %c0_i32_0 : i32, i32
  }
  func.func @transform_4(%arg0: i32) -> (i32, i32) {
    %c0_i32 = arith.constant 0 : i32
    %c0_i32_0 = arith.constant 0 : i32
    %c0_i32_1 = arith.constant 0 : i32
    return %c0_i32, %c0_i32_0 : i32, i32
  }
  func.func @transform_5(%arg0: i32) -> (i32, i32) {
    %c0_i32 = arith.constant 0 : i32
    %c0_i32_0 = arith.constant 0 : i32
    %c0_i32_1 = arith.constant 0 : i32
    return %c0_i32, %c0_i32_0 : i32, i32
  }
  func.func @transform_6(%arg0: i32) -> (i32, i32) {
    %c0_i32 = arith.constant 0 : i32
    %c0_i32_0 = arith.constant 0 : i32
    %c0_i32_1 = arith.constant 0 : i32
    return %c0_i32, %c0_i32_0 : i32, i32
  }
  func.func @transform_7(%arg0: i32) -> (i32, i32) {
    %c0_i32 = arith.constant 0 : i32
    %c0_i32_0 = arith.constant 0 : i32
    return %arg0, %c0_i32 : i32, i32
  }
}

</mosaic_0001>

<bundles_post_ra>
// kernel: tpu_custom_call.1
= control target key start
LH: loop header
LB: loop body
LE: loop exit
PB: predicated region body
PF: predicated region fallthrough
CT: control target
= control target key end

     0   :  { %12 = vsyncpa [#allocation3], 0  ;;  %s536_s0 = inlined_call_operand.hbm [shape: f32[8,32], index: 0, kind: input, shape index: {}]   ;;  %s537_s1 = inlined_call_operand.hbm [shape: bf16[32,64], index: 1, kind: input, shape index: {}]   ;;  %s538_s2 = inlined_call_operand.vmem [shape: f32[1,64], index: 2, kind: input, shape index: {}]   ;;  %s539_s3 = inlined_call_operand.hbm [shape: bf16[64,64], index: 3, kind: input, shape index: {}]   ;;  %s540_s4 = inlined_call_operand.vmem [shape: f32[1,64], index: 4, kind: input, shape index: {}]   ;;  %s541_s5 = inlined_call_operand.hbm [shape: bf16[64,128], index: 5, kind: input, shape index: {}]   ;;  %s542_s6 = inlined_call_operand.vmem [shape: f32[1,128], index: 6, kind: input, shape index: {}]   ;;  %s543_s7 = inlined_call_operand.hbm [shape: f32[8,128], index: 7, kind: output, shape index: {}]  }
   0x1   :  { %13 = vsyncpa [#allocation6], 0 }
   0x2   :  { %14 = vsyncpa [#allocation9], 0  ;;  %s31_s26 = sshll.u32 %s537_s1, 4  ;;  %s32_s26 = int_to_ptr.hbm [resolvable:$true] %s31_s26 }
   0x3   :  { %15 = vsyncpa [#allocation4], 0  ;;  %s465_s27 = smov [#allocation5]   ;;  %s21_s8 = sshll.u32 %s536_s0, 4  ;;  %s22_s8 = int_to_ptr.hbm [resolvable:$true] %s21_s8 }
   0x4   :  { %s33_s28 = sshll.u32 %s465_s27, 4  ;;  %s466_s9 = smov 64   ;;  %s34_s28 = int_to_ptr.vmem [resolvable:$true] %s33_s28 }
   0x5   :  { %s467_s10 = smov 4   ;;  %s468_s11 = smov [#allocation2]  }
   0x6   :  { %39 = dma.hbm_to_vmem [thread:$0]  %s32_s26, 256, %s34_s28, [#allocation6], %s466_s9, %s466_s9, %s467_s10  }
   0x7   :  { %s23_s12 = sshll.u32 %s468_s11, 4  ;;  %s46_s15 = sshll.u32 %s539_s3, 4  ;;  %s24_s12 = int_to_ptr.vmem [resolvable:$true] %s23_s12  ;;  %s47_s15 = int_to_ptr.hbm [resolvable:$true] %s46_s15 }
   0x8   :  { %26 = dma.hbm_to_vmem [thread:$0]  %s22_s8, 128, %s24_s12, [#allocation3]  }
   0x9   :  { %s61_s17 = sshll.u32 %s541_s5, 4  ;;  %s469_s18 = smov [#allocation7]   ;;  %s62_s17 = int_to_ptr.hbm [resolvable:$true] %s61_s17 }
   0xa   :  { %s48_s19 = sshll.u32 %s469_s18, 4  ;;  %s470_s0 = smov [#allocation8]   ;;  %s49_s19 = int_to_ptr.vmem [resolvable:$true] %s48_s19 }
   0xb   :  { %54 = dma.hbm_to_vmem [thread:$0]  %s47_s15, 512, %s49_s19, [#allocation6], %s466_s9, %s466_s9, %s467_s10  }
   0xc   :  { %s63_s20 = sshll.u32 %s470_s0, 4  ;;  %s64_s20 = int_to_ptr.vmem [resolvable:$true] %s63_s20 }
   0xd   :  { %69 = dma.hbm_to_vmem [thread:$0]  %s62_s17, 512, %s64_s20, [#allocation9], %s466_s9, %s466_s9, %s467_s10  }
   0xe   :  { %457 = dma.done.wait [#allocation3], 128  }
   0xf   :  { %458 = vsyncadd [#allocation3], 4294967168 }
  0x10   :  { %459 = dma.done.wait [#allocation6], 768  }
  0x11   :  { %460 = vsyncadd [#allocation6], 4294966528 }
  0x12   :  { %461 = dma.done.wait [#allocation9], 512  }
  0x13   :  { %462 = vsyncadd [#allocation9], 4294966784  ;;  %v314_v0 = vld [vmem:[#allocation5 + $0x8] sm:$0xff]  ;;  %v313_v1 = vld [vmem:[#allocation5] sm:$0xff]  ;;  %vm111_vm0 = vcmask 261120   ;;  %vm166_vm1 = vcmask 523264   ;;  %v237_v24 = vlaneseq }
  0x14   :  { %v318_v2 = vld [vmem:[#allocation7 + $0x18] sm:$0xff]  ;;  %121 = vmatpush.bf16.msra.mxu0 %v314_v0  ;;  %v89_v3 = vld [vmem:[#allocation2] sm:$0xff]  ;;  %v317_v4 = vld [vmem:[#allocation7 + $0x10] sm:$0xff] }
  0x15   :  { %174 = vmatpush.bf16.msra.mxu1 %v318_v2  ;;  %v90_v5 = vpack.c.bf16 %v89_v3, %v89_v3  ;;  %v316_v6 = vld [vmem:[#allocation7 + $0x8] sm:$0xff]  ;;  %v315_v7 = vld [vmem:[#allocation7] sm:$0xff]  ;;  %v322_v8 = vld [vmem:[#allocation8 + $0x18] sm:$0xff]  ;;  %v238_v25 = vand.u32 127, %v237_v24 }
  0x16   :  { %228 = vmatpush.bf16.msra.mxu2 %v322_v8  ;;  %v321_v9 = vld [vmem:[#allocation8 + $0x10] sm:$0xff]  ;;  %v330_v10 = vld [vmem:[%s538_s2] ss:$0 sm:$0xff]  ;;  %v319_v17 = vld [vmem:[#allocation8] sm:$0xff] }
  0x17   :  { %v320_v16 = vld [vmem:[#allocation8 + $0x8] sm:$0xff]  ;;  %vm239_vm2 = vcmp.lt.s32.totalorder %v238_v25, 16 }
  0x18   :  { %122 = vmatpush.bf16.msra.mxu0 %v313_v1  ;;  %v331_v18 = vld [vmem:[%s540_s4] ss:$0 sm:$0xff]  ;;  %s471_s4 = smov [#allocation10]  }
  0x19   :  { %175 = vmatpush.bf16.msra.mxu1 %v317_v4  ;;  %v332_v26 = vld [vmem:[%s542_s6] ss:$0 sm:$0xff]  ;;  %s256_s24 = sshll.u32 %s471_s4, 4  ;;  %s258_s6 = sshll.u32 %s543_s7, 4  ;;  %s257_s24 = int_to_ptr.vmem [resolvable:$true] %s256_s24  ;;  %s259_s6 = int_to_ptr.hbm [resolvable:$true] %s258_s6 }
  0x1a   :  { %229 = vmatpush.bf16.msra.mxu2 %v321_v9 }
  0x1b   :  { %278 = vmatmul.msk.bf16.vlgmr.msra.gmra.mxu0 %vm111_vm0, %v90_v5 }
  0x1d   :  { %176 = vmatpush.bf16.msra.mxu1 %v316_v6 }
  0x1e   :  { %230 = vmatpush.bf16.msra.mxu2 %v320_v16 }
  0x21   :  { %177 = vmatpush.bf16.msra.mxu1 %v315_v7 }
  0x22   :  { %231 = vmatpush.bf16.msra.mxu2 %v319_v17 }
  0x98   :  { %v124_v11 = vpop.f32.mrf.mxu0 }
  0x99   :  { %v125_v12 = vadd.f32 %v330_v10, %v124_v11 }
  0x9b   :  { %v128_v13 = vmax.f32 %v125_v12, 0.0 }
  0x9d   :  { %v129_v14 = vpack.c.bf16 %v128_v13, %v128_v13 }
  0x9f   :  { %295 = vmatmul.msk.bf16.vlgmr.msra.gmra.mxu1 %vm166_vm1, %v129_v14 }
  0xa0   :  { %v126_v15 = vpop.f32.mrf.mxu0 }
 0x11c   :  { %v179_v19 = vpop.f32.mrf.mxu1 }
 0x11d   :  { %v180_v20 = vadd.f32 %v331_v18, %v179_v19 }
 0x11f   :  { %v183_v21 = vmax.f32 %v180_v20, 0.0 }
 0x121   :  { %v184_v22 = vpack.c.bf16 %v183_v21, %v183_v21 }
 0x123   :  { %312 = vmatmul.msk.bf16.vlgmr.msra.gmra.mxu2 %vm166_vm1, %v184_v22 }
 0x124   :  { %v181_v23 = vpop.f32.mrf.mxu1 }
 0x1a6   :  { %v233_v27 = vpop.f32.mrf.mxu2 }
 0x1a7   :  { %v234_v28 = vadd.f32 %v332_v26, %v233_v27 }
 0x1a9   :  { %v240_v29 = vsel %vm239_vm2, %v234_v28, -1e+30 }
 0x1aa   :  { %241 = vmax.xlane.f32.xlu0 %v240_v29 }
 0x1ae   :  { %v235_v30 = vpop.f32.mrf.mxu2 }
 0x21d   :  { %v242_v31 = vpop.xlane.xlu0 %241 }
 0x21e   :  { %v243_v32 = vsub.f32 %v240_v29, %v242_v31 }
 0x220   :  { %v244_v33 = vmul.f32 1.442695, %v243_v32 }
 0x222   :  { %333 = vpow2.f32 %v244_v33 }
 0x228   :  { %v334_v34 = vpop.eup %333 }
 0x229   :  { %246 = vadd.xlane.f32.xlu0 %v334_v34 }
 0x29c   :  { %v247_v35 = vpop.xlane.xlu0 %246 }
 0x29d   :  { %335 = vrcp.f32 %v247_v35 }
 0x2a3   :  { %v336_v36 = vpop.eup %335 }
 0x2a4   :  { %v249_v37 = vmul.f32 %v336_v36, %v334_v34 }
 0x2a6   :  { %250 = vst [vmem:[#allocation10] sm:$0xff] %v249_v37 }
 0x2a7   :  { %261 = dma.vmem_to_hbm [thread:$0]  %s257_s24, 128, %s259_s6, [#allocation4]  }
 0x2a8   :  { %463 = dma.done.wait [#allocation4], 128  }
 0x2a9   :  { %464 = vsyncadd [#allocation4], 4294967168 }
 0x2aa   :  { %266 = vsyncpa [#allocation3], 1 }
 0x2ab   :  { %267 = vsyncpa [#allocation6], 1 }
 0x2ac   :  { %268 = vsyncpa [#allocation9], 1 }
 0x2ad   :  { %269 = vsyncpa [#allocation4], 1 }

</bundles_post_ra>
